<compile_context>
chip_gen: v7x
topology: tpu7x:2x2x1
jax: 0.10.0
libtpu: 0.0.40
codegen_flags: <defaults>
</compile_context>

<pallas_src>
import math

import jax
import jax.numpy as jnp
from jax import lax
from jax.experimental import pallas as pl
from jax.experimental.pallas import tpu as pltpu


# ------------------------------ fused kernel ------------------------------- #

def _mha_fused_kernel(q_ref, k_ref, v_ref,
                      wq_ref, wk_ref, wv_ref, wo_ref,
                      bq_ref, bk_ref, bv_ref, bo_ref,
                      o_ref,
                      kp_scr, vp_scr):
    """One (batch, q-tile) grid step of the fused forward pass.

    q_ref:  [1, tq, D] f32      k_ref / v_ref: [1, S, D] f32
    w*_ref: [D, D] bf16 (pre-transposed x @ W layout; scale folded into wq)
    b*_ref: [1, D]  f32 (scale folded into bq)
    o_ref:  [1, tq, D] f32
    kp_scr / vp_scr: [S, D] bf16 scratch with projected K / V for the current
    batch row (computed once per batch row, reused across q tiles).
    """
    bf16 = jnp.bfloat16
    f32 = jnp.float32
    qi = pl.program_id(1)

    # K / V projections are shared by every q tile of this batch row.
    # NOTE: only correct because the q-tile axis is "arbitrary" (sequential);
    # do NOT mark it "parallel" without redundant projection per core.
    @pl.when(qi == 0)
    def _():
        kp = jnp.dot(k_ref[0].astype(bf16), wk_ref[...],
                     preferred_element_type=f32) + bk_ref[...]
        vp = jnp.dot(v_ref[0].astype(bf16), wv_ref[...],
                     preferred_element_type=f32) + bv_ref[...]
        kp_scr[...] = kp.astype(bf16)
        vp_scr[...] = vp.astype(bf16)

    # Q projection; the literal .div(inv_scale) factor is already folded into
    # wq / bq at init, so no per-step scaling here.
    qp = jnp.dot(q_ref[0].astype(bf16), wq_ref[...],
                 preferred_element_type=f32) + bq_ref[...]          # [tq, D] f32

    # matmul(q, k^T): the K transpose is absorbed into the dot_general
    # contraction (same bqd,bkd pattern as the reference flash kernel, so
    # MXU-native, no XLU transpose of the kp tile).
    s = lax.dot_general(qp.astype(bf16), kp_scr[...],
                        (((1,), (1,)), ((), ())),
                        preferred_element_type=f32)                 # [tq, S] f32

    # softmax(dim=-1), numerically stable, VPU math kept in f32.
    # Normalization is DEFERRED to after the PV matmul: only the [tq, D]
    # result is scaled (reciprocal runs on the EUP slot).
    s = s - jnp.max(s, axis=-1, keepdims=True)
    p = jnp.exp(s)                                                  # [tq, S] f32
    l = jnp.sum(p, axis=-1, keepdims=True)                          # [tq, 1] f32

    a = jnp.dot(p.astype(bf16), vp_scr[...],
                preferred_element_type=f32)                         # [tq, D] f32
    a = a * pl.reciprocal(l, approx=True)

    o = jnp.dot(a.astype(bf16), wo_ref[...],
                preferred_element_type=f32) + bo_ref[...]
    o_ref[0] = o.astype(o_ref.dtype)


# ------------------------------ host helpers ------------------------------- #

def _choose_q_tile(seq_len, cap=256):
    # Cap tq (perf review): 256 keeps the live f32 score chain (~3*tq*S*4 B)
    # small enough to avoid vreg spills / vst-slot saturation on v5e and to
    # fit v7x's 64 MiB VMEM; per-step pipeline overhead (~0.35 us) is
    # negligible at these sizes.
    for t in (cap, 128):
        if t <= seq_len and seq_len % t == 0:
            return t
    return seq_len


def _vmem_limit_bytes(S, D, tq):
    f32b, bf16b = 4, 2
    io_tiles = 2 * 2 * tq * D * f32b            # q + o tiles, double-buffered
    kv_raw   = 2 * 2 * S * D * f32b             # raw k / v blocks, double-buffered
    weights  = 4 * 2 * D * D * bf16b            # 4 bf16 weights, double-buffered
    biases   = 4 * 2 * D * f32b
    scratch  = 2 * S * D * bf16b                # projected kp / vp scratch
    scores   = 3 * tq * S * f32b                # score / exp / reduction temps
    total = io_tiles + kv_raw + weights + biases + scratch + scores
    total = int(total * 1.3) + (1 << 20)        # ~30% headroom + 1 MiB
    # Floor at the default scoped limit, cap at v5e/v6e physical VMEM.  For
    # v7x deployments min() this with pltpu.get_tpu_info().vmem_capacity_bytes.
    return max(32 << 20, min(total, 128 << 20))


def mha_forward(q, k, v, wq_t, wk_t, wv_t, wo_t, bq, bk, bv, bo):
    """Fused fc_q/k/v -> attention -> fc_o.  q, k, v: [B, S, D] -> [B, S, D]."""
    B, S, D = q.shape
    tq = _choose_q_tile(S)
    nq = S // tq

    w_spec = pl.BlockSpec((D, D), lambda b, i: (0, 0))
    b_spec = pl.BlockSpec((1, D), lambda b, i: (0, 0))
    q_spec = pl.BlockSpec((1, tq, D), lambda b, i: (b, i, 0))
    kv_spec = pl.BlockSpec((1, S, D), lambda b, i: (b, 0, 0))

    return pl.pallas_call(
        _mha_fused_kernel,
        out_shape=jax.ShapeDtypeStruct((B, S, D), q.dtype),
        grid=(B, nq),
        in_specs=[q_spec, kv_spec, kv_spec,
                  w_spec, w_spec, w_spec, w_spec,
                  b_spec, b_spec, b_spec, b_spec],
        out_specs=pl.BlockSpec((1, tq, D), lambda b, i: (b, i, 0)),
        scratch_shapes=[pltpu.VMEM((S, D), jnp.bfloat16),
                        pltpu.VMEM((S, D), jnp.bfloat16)],
        compiler_params=pltpu.CompilerParams(
            dimension_semantics=("parallel", "arbitrary"),
            vmem_limit_bytes=_vmem_limit_bytes(S, D, tq)),
    )(q, k, v, wq_t, wk_t, wv_t, wo_t,
      bq.reshape(1, D), bk.reshape(1, D), bv.reshape(1, D), bo.reshape(1, D))


# ------------------------------ module wrapper ------------------------------ #

class MultiHeadAttentionPallas:
    def __init__(self, d_model, num_heads, key):
        assert d_model % num_heads == 0
        # The original module's final `.view(a.shape[1], -1, a.shape[3])` feeds
        # a Linear(d_model, d_model) with a last dim of d_k, so it is only
        # shape-correct (hence runnable) for num_heads == 1.
        assert num_heads == 1, "original module is only shape-correct for num_heads == 1"
        self.d_model = d_model
        self.num_heads = num_heads
        self.d_k = d_model // num_heads

        keys = jax.random.split(key, 8)

        def init_linear(kw, kb, fan_in, fan_out):
            # Mimics torch.nn.Linear default init (uniform +-1/sqrt(fan_in)).
            bound = 1.0 / math.sqrt(fan_in)
            w = jax.random.uniform(kw, (fan_out, fan_in), jnp.float32, -bound, bound)
            b = jax.random.uniform(kb, (fan_out,), jnp.float32, -bound, bound)
            return w, b

        wq, bq = init_linear(keys[0], keys[1], d_model, d_model)
        wk, bk = init_linear(keys[2], keys[3], d_model, d_model)
        wv, bv = init_linear(keys[4], keys[5], d_model, d_model)
        wo, bo = init_linear(keys[6], keys[7], d_model, d_model)

        # f32 originals kept only for the pure-f32 reference check.
        self._f32 = dict(wq=wq, wk=wk, wv=wv, wo=wo, bq=bq, bk=bk, bv=bv, bo=bo)

        # Fold the literal `.div(inv_scale)` factor (== sqrt(d_k)) into the Q
        # projection once; pre-transpose PyTorch [out, in] -> [in, out] so the
        # kernel does x @ W with no in-kernel transpose; store the MXU
        # operands in bf16 (f32 accumulation happens in-kernel).
        scale = float(self.d_k) ** 0.5           # == 1 / inv_scale
        self.wq_t = (wq.T * scale).astype(jnp.bfloat16)
        self.bq = bq * scale
        self.wk_t = wk.T.astype(jnp.bfloat16)
        self.bk = bk
        self.wv_t = wv.T.astype(jnp.bfloat16)
        self.bv = bv
        self.wo_t = wo.T.astype(jnp.bfloat16)
        self.bo = bo

    def __call__(self, q, k, v):
        return mha_forward(q, k, v,
                           self.wq_t, self.wk_t, self.wv_t, self.wo_t,
                           self.bq, self.bk, self.bv, self.bo)


# ------------------------------ references ---------------------------------- #

def _ref_matched(q, k, v, m):
    """Pure-JAX reference using the same bf16-operand / f32-accumulate recipe
    (exact softmax division instead of the approx reciprocal)."""
    bf16, f32 = jnp.bfloat16, jnp.float32

    def lin(x, w_t, b):
        return jnp.dot(x.astype(bf16), w_t, preferred_element_type=f32) + b

    qp = lin(q, m.wq_t, m.bq)                      # scale already folded
    kp = lin(k, m.wk_t, m.bk).astype(bf16)
    vp = lin(v, m.wv_t, m.bv).astype(bf16)
    s = jnp.einsum("bqd,bkd->bqk", qp.astype(bf16), kp,
                   preferred_element_type=f32)
    s = s - jnp.max(s, axis=-1, keepdims=True)
    p = jnp.exp(s)
    l = jnp.sum(p, axis=-1, keepdims=True)
    a = jnp.einsum("bqk,bkd->bqd", p.astype(bf16), vp,
                   preferred_element_type=f32) / l
    return jnp.dot(a.astype(bf16), m.wo_t, preferred_element_type=f32) + m.bo


def _ref_f32(q, k, v, m):
    """Literal f32 transcription of the original PyTorch module (num_heads==1)."""
    p = m._f32

    def lin(x, w, b):
        return x @ w.T + b

    qp = lin(q, p["wq"], p["bq"])
    kp = lin(k, p["wk"], p["bk"])
    vp = lin(v, p["wv"], p["bv"])
    inv_scale = 1.0 / (m.d_k ** 0.5)
    s = jnp.einsum("bqd,bkd->bqk", qp, kp) / inv_scale   # literal .div(inv_scale)
    attn = jax.nn.softmax(s, axis=-1)
    a = jnp.einsum("bqk,bkd->bqd", attn, vp)
    return lin(a, p["wo"], p["bo"])


# ----------------------------------- main ----------------------------------- #

if __name__ == "__main__":
    # NOTE: demo shape is intentionally tiny; perf tuning (tq, dtypes, VMEM
    # limit) is meant for D >= 128 and S >= 512 where the MXU / vreg fill up.
    B, S, d_model, num_heads = 2, 8, 32, 1   # num_heads=1: only runnable config of the original

    key = jax.random.PRNGKey(0)
    kq, kk, kv_, kparams = jax.random.split(key, 4)
    q = jax.random.normal(kq, (B, S, d_model), jnp.float32)
    k = jax.random.normal(kk, (B, S, d_model), jnp.float32)
    v = jax.random.normal(kv_, (B, S, d_model), jnp.float32)

    mha = MultiHeadAttentionPallas(d_model, num_heads, kparams)
    out = jax.block_until_ready(mha(q, k, v))

    assert out.shape == (B, S * num_heads, d_model), out.shape
    assert bool(jnp.all(jnp.isfinite(out)))

    # Tight check against a reference computed with the identical mixed
    # precision (covers the approx-reciprocal + deferred normalization only).
    ref_m = _ref_matched(q, k, v, mha)
    err_m = float(jnp.max(jnp.abs(out - ref_m)))
    assert jnp.allclose(out, ref_m, rtol=2e-2, atol=2e-2), err_m

    # Looser semantic check against a pure-f32 transcription of the module
    # (difference is dominated by the intentional bf16 MXU operands).
    ref_f = _ref_f32(q, k, v, mha)
    err_f = float(jnp.max(jnp.abs(out - ref_f)))
    assert jnp.allclose(out, ref_f, rtol=1e-1, atol=1e-1), err_f

    print("KERNEL_OK")
</pallas_src>

<mosaic_0001>
module attributes {stable_mosaic.version = 11 : i64} {
  func.func @_mha_fused_kernel(%arg0: i32, %arg1: i32, %arg2: memref<1x8x32xf32, #tpu.memory_space<vmem>>, %arg3: memref<1x8x32xf32, #tpu.memory_space<vmem>>, %arg4: memref<1x8x32xf32, #tpu.memory_space<vmem>>, %arg5: memref<32x32xbf16, #tpu.memory_space<vmem>>, %arg6: memref<32x32xbf16, #tpu.memory_space<vmem>>, %arg7: memref<32x32xbf16, #tpu.memory_space<vmem>>, %arg8: memref<32x32xbf16, #tpu.memory_space<vmem>>, %arg9: memref<1x32xf32, #tpu.memory_space<vmem>>, %arg10: memref<1x32xf32, #tpu.memory_space<vmem>>, %arg11: memref<1x32xf32, #tpu.memory_space<vmem>>, %arg12: memref<1x32xf32, #tpu.memory_space<vmem>>, %arg13: memref<1x8x32xf32, #tpu.memory_space<vmem>>, %arg14: memref<8x32xbf16, #tpu.memory_space<vmem>>, %arg15: memref<8x32xbf16, #tpu.memory_space<vmem>>) attributes {dimension_semantics = [#tpu.dimension_semantics<parallel>, #tpu.dimension_semantics<arbitrary>], iteration_bounds = array<i64: 2, 1>, scalar_prefetch = 0 : i64, scratch_operands = 2 : i64, tpu.core_type = #tpu.core_type<tc>, window_params = [{transform_indices = @transform_0, window_bounds = array<i64: 1, 8, 32>}, {transform_indices = @transform_1, window_bounds = array<i64: 1, 8, 32>}, {transform_indices = @transform_2, window_bounds = array<i64: 1, 8, 32>}, {pipeline_mode = #tpu.pipeline_mode<synchronous>, transform_indices = @transform_3, window_bounds = array<i64: 32, 32>}, {pipeline_mode = #tpu.pipeline_mode<synchronous>, transform_indices = @transform_4, window_bounds = array<i64: 32, 32>}, {pipeline_mode = #tpu.pipeline_mode<synchronous>, transform_indices = @transform_5, window_bounds = array<i64: 32, 32>}, {pipeline_mode = #tpu.pipeline_mode<synchronous>, transform_indices = @transform_6, window_bounds = array<i64: 32, 32>}, {pipeline_mode = #tpu.pipeline_mode<synchronous>, transform_indices = @transform_7, window_bounds = array<i64: 1, 32>}, {pipeline_mode = #tpu.pipeline_mode<synchronous>, transform_indices = @transform_8, window_bounds = array<i64: 1, 32>}, {pipeline_mode = #tpu.pipeline_mode<synchronous>, transform_indices = @transform_9, window_bounds = array<i64: 1, 32>}, {pipeline_mode = #tpu.pipeline_mode<synchronous>, transform_indices = @transform_10, window_bounds = array<i64: 1, 32>}, {transform_indices = @transform_11, window_bounds = array<i64: 1, 8, 32>}]} {
    %c0_i32 = arith.constant 0 : i32
    %0 = arith.cmpi eq, %arg1, %c0_i32 : i32
    %1 = arith.extui %0 : i1 to i32
    %c0_i32_0 = arith.constant 0 : i32
    %2 = arith.cmpi ne, %1, %c0_i32_0 : i32
    scf.if %2 {
      %c0_23 = arith.constant 0 : index
      %c0_24 = arith.constant 0 : index
      %c0_25 = arith.constant 0 : index
      %36 = vector.load %arg3[%c0_23, %c0_24, %c0_25] : memref<1x8x32xf32, #tpu.memory_space<vmem>>, vector<1x8x32xf32>
      %37 = vector.shape_cast %36 : vector<1x8x32xf32> to vector<8x32xf32>
      %38 = arith.truncf %37 : vector<8x32xf32> to vector<8x32xbf16>
      %c0_26 = arith.constant 0 : index
      %c0_27 = arith.constant 0 : index
      %39 = vector.load %arg6[%c0_26, %c0_27] : memref<32x32xbf16, #tpu.memory_space<vmem>>, vector<32x32xbf16>
      %cst_28 = arith.constant dense<0.000000e+00> : vector<8x32xf32>
      %40 = tpu.matmul %38, %39, %cst_28 {dimension_numbers = #tpu.dot_dimension_numbers<[1], [0], [0], [1], [0, 0, 1, 1], [], []>} : vector<8x32xbf16>, vector<32x32xbf16>, vector<8x32xf32> -> vector<8x32xf32>
      %c0_29 = arith.constant 0 : index
      %c0_30 = arith.constant 0 : index
      %41 = vector.load %arg10[%c0_29, %c0_30] : memref<1x32xf32, #tpu.memory_space<vmem>>, vector<1x32xf32>
      %42 = vector.broadcast %41 : vector<1x32xf32> to vector<8x32xf32>
      %43 = arith.addf %40, %42 : vector<8x32xf32>
      %c0_31 = arith.constant 0 : index
      %c0_32 = arith.constant 0 : index
      %c0_33 = arith.constant 0 : index
      %44 = vector.load %arg4[%c0_31, %c0_32, %c0_33] : memref<1x8x32xf32, #tpu.memory_space<vmem>>, vector<1x8x32xf32>
      %45 = vector.shape_cast %44 : vector<1x8x32xf32> to vector<8x32xf32>
      %46 = arith.truncf %45 : vector<8x32xf32> to vector<8x32xbf16>
      %c0_34 = arith.constant 0 : index
      %c0_35 = arith.constant 0 : index
      %47 = vector.load %arg7[%c0_34, %c0_35] : memref<32x32xbf16, #tpu.memory_space<vmem>>, vector<32x32xbf16>
      %cst_36 = arith.constant dense<0.000000e+00> : vector<8x32xf32>
      %48 = tpu.matmul %46, %47, %cst_36 {dimension_numbers = #tpu.dot_dimension_numbers<[1], [0], [0], [1], [0, 0, 1, 1], [], []>} : vector<8x32xbf16>, vector<32x32xbf16>, vector<8x32xf32> -> vector<8x32xf32>
      %c0_37 = arith.constant 0 : index
      %c0_38 = arith.constant 0 : index
      %49 = vector.load %arg11[%c0_37, %c0_38] : memref<1x32xf32, #tpu.memory_space<vmem>>, vector<1x32xf32>
      %50 = vector.broadcast %49 : vector<1x32xf32> to vector<8x32xf32>
      %51 = arith.addf %48, %50 : vector<8x32xf32>
      %52 = arith.truncf %43 : vector<8x32xf32> to vector<8x32xbf16>
      %c0_39 = arith.constant 0 : index
      %c0_40 = arith.constant 0 : index
      %53 = vector.load %arg14[%c0_39, %c0_40] : memref<8x32xbf16, #tpu.memory_space<vmem>>, vector<8x32xbf16>
      tpu.vector_store %arg14[%c0_39, %c0_40], %52 {strides = array<i32>} : memref<8x32xbf16, #tpu.memory_space<vmem>>, vector<8x32xbf16>,
      %54 = arith.truncf %51 : vector<8x32xf32> to vector<8x32xbf16>
      %c0_41 = arith.constant 0 : index
      %c0_42 = arith.constant 0 : index
      %55 = vector.load %arg15[%c0_41, %c0_42] : memref<8x32xbf16, #tpu.memory_space<vmem>>, vector<8x32xbf16>
      tpu.vector_store %arg15[%c0_41, %c0_42], %54 {strides = array<i32>} : memref<8x32xbf16, #tpu.memory_space<vmem>>, vector<8x32xbf16>,
    } else {
    }
    %c0 = arith.constant 0 : index
    %c0_1 = arith.constant 0 : index
    %c0_2 = arith.constant 0 : index
    %3 = vector.load %arg2[%c0, %c0_1, %c0_2] : memref<1x8x32xf32, #tpu.memory_space<vmem>>, vector<1x8x32xf32>
    %4 = vector.shape_cast %3 : vector<1x8x32xf32> to vector<8x32xf32>
    %5 = arith.truncf %4 : vector<8x32xf32> to vector<8x32xbf16>
    %c0_3 = arith.constant 0 : index
    %c0_4 = arith.constant 0 : index
    %6 = vector.load %arg5[%c0_3, %c0_4] : memref<32x32xbf16, #tpu.memory_space<vmem>>, vector<32x32xbf16>
    %cst = arith.constant dense<0.000000e+00> : vector<8x32xf32>
    %7 = tpu.matmul %5, %6, %cst {dimension_numbers = #tpu.dot_dimension_numbers<[1], [0], [0], [1], [0, 0, 1, 1], [], []>} : vector<8x32xbf16>, vector<32x32xbf16>, vector<8x32xf32> -> vector<8x32xf32>
    %c0_5 = arith.constant 0 : index
    %c0_6 = arith.constant 0 : index
    %8 = vector.load %arg9[%c0_5, %c0_6] : memref<1x32xf32, #tpu.memory_space<vmem>>, vector<1x32xf32>
    %9 = vector.broadcast %8 : vector<1x32xf32> to vector<8x32xf32>
    %10 = arith.addf %7, %9 : vector<8x32xf32>
    %11 = arith.truncf %10 : vector<8x32xf32> to vector<8x32xbf16>
    %c0_7 = arith.constant 0 : index
    %c0_8 = arith.constant 0 : index
    %12 = vector.load %arg14[%c0_7, %c0_8] : memref<8x32xbf16, #tpu.memory_space<vmem>>, vector<8x32xbf16>
    %cst_9 = arith.constant dense<0.000000e+00> : vector<8x8xf32>
    %13 = tpu.matmul %11, %12, %cst_9 {dimension_numbers = #tpu.dot_dimension_numbers<[1], [1], [0], [0], [0, 0, 1, 0], [], []>} : vector<8x32xbf16>, vector<8x32xbf16>, vector<8x8xf32> -> vector<8x8xf32>
    %cst_10 = arith.constant dense<0xFF800000> : vector<8xf32>
    %14 = vector.multi_reduction <maximumf>, %13, %cst_10 [1] : vector<8x8xf32> to vector<8xf32>
    %15 = vector.shape_cast %14 : vector<8xf32> to vector<8x1xf32>
    %16 = vector.broadcast %15 : vector<8x1xf32> to vector<8x8xf32>
    %17 = arith.subf %13, %16 : vector<8x8xf32>
    %18 = math.exp %17 : vector<8x8xf32>
    %cst_11 = arith.constant dense<0.000000e+00> : vector<8xf32>
    %19 = vector.multi_reduction <add>, %18, %cst_11 [1] : vector<8x8xf32> to vector<8xf32>
    %20 = vector.shape_cast %19 : vector<8xf32> to vector<8x1xf32>
    %21 = arith.truncf %18 : vector<8x8xf32> to vector<8x8xbf16>
    %c0_12 = arith.constant 0 : index
    %c0_13 = arith.constant 0 : index
    %22 = vector.load %arg15[%c0_12, %c0_13] : memref<8x32xbf16, #tpu.memory_space<vmem>>, vector<8x32xbf16>
    %cst_14 = arith.constant dense<0.000000e+00> : vector<8x32xf32>
    %23 = tpu.matmul %21, %22, %cst_14 {dimension_numbers = #tpu.dot_dimension_numbers<[1], [0], [0], [1], [0, 0, 1, 1], [], []>} : vector<8x8xbf16>, vector<8x32xbf16>, vector<8x32xf32> -> vector<8x32xf32>
    %24 = tpu.reciprocal %20 {approx = true} : vector<8x1xf32> -> vector<8x1xf32>
    %25 = vector.broadcast %24 : vector<8x1xf32> to vector<8x32xf32>
    %26 = arith.mulf %23, %25 : vector<8x32xf32>
    %27 = arith.truncf %26 : vector<8x32xf32> to vector<8x32xbf16>
    %c0_15 = arith.constant 0 : index
    %c0_16 = arith.constant 0 : index
    %28 = vector.load %arg8[%c0_15, %c0_16] : memref<32x32xbf16, #tpu.memory_space<vmem>>, vector<32x32xbf16>
    %cst_17 = arith.constant dense<0.000000e+00> : vector<8x32xf32>
    %29 = tpu.matmul %27, %28, %cst_17 {dimension_numbers = #tpu.dot_dimension_numbers<[1], [0], [0], [1], [0, 0, 1, 1], [], []>} : vector<8x32xbf16>, vector<32x32xbf16>, vector<8x32xf32> -> vector<8x32xf32>
    %c0_18 = arith.constant 0 : index
    %c0_19 = arith.constant 0 : index
    %30 = vector.load %arg12[%c0_18, %c0_19] : memref<1x32xf32, #tpu.memory_space<vmem>>, vector<1x32xf32>
    %31 = vector.broadcast %30 : vector<1x32xf32> to vector<8x32xf32>
    %32 = arith.addf %29, %31 : vector<8x32xf32>
    %c0_20 = arith.constant 0 : index
    %c0_21 = arith.constant 0 : index
    %c0_22 = arith.constant 0 : index
    %33 = vector.load %arg13[%c0_20, %c0_21, %c0_22] : memref<1x8x32xf32, #tpu.memory_space<vmem>>, vector<1x8x32xf32>
    %34 = vector.shape_cast %33 : vector<1x8x32xf32> to vector<8x32xf32>
    %35 = vector.shape_cast %32 : vector<8x32xf32> to vector<1x8x32xf32>
    tpu.vector_store %arg13[%c0_20, %c0_21, %c0_22], %35 {strides = array<i32>} : memref<1x8x32xf32, #tpu.memory_space<vmem>>, vector<1x8x32xf32>,
    return
  }
  func.func @transform_0(%arg0: i32, %arg1: i32) -> (i32, i32, i32) {
    %c0_i32 = arith.constant 0 : i32
    %c0_i32_0 = arith.constant 0 : i32
    return %arg0, %arg1, %c0_i32 : i32, i32, i32
  }
  func.func @transform_1(%arg0: i32, %arg1: i32) -> (i32, i32, i32) {
    %c0_i32 = arith.constant 0 : i32
    %c0_i32_0 = arith.constant 0 : i32
    %c0_i32_1 = arith.constant 0 : i32
    return %arg0, %c0_i32, %c0_i32_0 : i32, i32, i32
  }
  func.func @transform_2(%arg0: i32, %arg1: i32) -> (i32, i32, i32) {
    %c0_i32 = arith.constant 0 : i32
    %c0_i32_0 = arith.constant 0 : i32
    %c0_i32_1 = arith.constant 0 : i32
    return %arg0, %c0_i32, %c0_i32_0 : i32, i32, i32
  }
  func.func @transform_3(%arg0: i32, %arg1: i32) -> (i32, i32) {
    %c0_i32 = arith.constant 0 : i32
    %c0_i32_0 = arith.constant 0 : i32
    %c0_i32_1 = arith.constant 0 : i32
    return %c0_i32, %c0_i32_0 : i32, i32
  }
  func.func @transform_4(%arg0: i32, %arg1: i32) -> (i32, i32) {
    %c0_i32 = arith.constant 0 : i32
    %c0_i32_0 = arith.constant 0 : i32
    %c0_i32_1 = arith.constant 0 : i32
    return %c0_i32, %c0_i32_0 : i32, i32
  }
  func.func @transform_5(%arg0: i32, %arg1: i32) -> (i32, i32) {
    %c0_i32 = arith.constant 0 : i32
    %c0_i32_0 = arith.constant 0 : i32
    %c0_i32_1 = arith.constant 0 : i32
    return %c0_i32, %c0_i32_0 : i32, i32
  }
  func.func @transform_6(%arg0: i32, %arg1: i32) -> (i32, i32) {
    %c0_i32 = arith.constant 0 : i32
    %c0_i32_0 = arith.constant 0 : i32
    %c0_i32_1 = arith.constant 0 : i32
    return %c0_i32, %c0_i32_0 : i32, i32
  }
  func.func @transform_7(%arg0: i32, %arg1: i32) -> (i32, i32) {
    %c0_i32 = arith.constant 0 : i32
    %c0_i32_0 = arith.constant 0 : i32
    %c0_i32_1 = arith.constant 0 : i32
    return %c0_i32, %c0_i32_0 : i32, i32
  }
  func.func @transform_8(%arg0: i32, %arg1: i32) -> (i32, i32) {
    %c0_i32 = arith.constant 0 : i32
    %c0_i32_0 = arith.constant 0 : i32
    %c0_i32_1 = arith.constant 0 : i32
    return %c0_i32, %c0_i32_0 : i32, i32
  }
  func.func @transform_9(%arg0: i32, %arg1: i32) -> (i32, i32) {
    %c0_i32 = arith.constant 0 : i32
    %c0_i32_0 = arith.constant 0 : i32
    %c0_i32_1 = arith.constant 0 : i32
    return %c0_i32, %c0_i32_0 : i32, i32
  }
  func.func @transform_10(%arg0: i32, %arg1: i32) -> (i32, i32) {
    %c0_i32 = arith.constant 0 : i32
    %c0_i32_0 = arith.constant 0 : i32
    %c0_i32_1 = arith.constant 0 : i32
    return %c0_i32, %c0_i32_0 : i32, i32
  }
  func.func @transform_11(%arg0: i32, %arg1: i32) -> (i32, i32, i32) {
    %c0_i32 = arith.constant 0 : i32
    %c0_i32_0 = arith.constant 0 : i32
    return %arg0, %arg1, %c0_i32 : i32, i32, i32
  }
}

</mosaic_0001>

<bundles_post_ra>
// kernel: tpu_custom_call.1
= control target key start
LH: loop header
LB: loop body
LE: loop exit
PB: predicated region body
PF: predicated region fallthrough
CT: control target
= control target key end

     0   :  { %s2050_s0 = inlined_call_operand.hbm [shape: f32[2,8,32], index: 0, kind: input, shape index: {}]   ;;  %s2051_s1 = inlined_call_operand.hbm [shape: f32[2,8,32], index: 1, kind: input, shape index: {}]   ;;  %s2052_s2 = inlined_call_operand.hbm [shape: f32[2,8,32], index: 2, kind: input, shape index: {}]   ;;  %s2053_s3 = inlined_call_operand.hbm [shape: bf16[32,32], index: 3, kind: input, shape index: {}]   ;;  %s2054_s4 = inlined_call_operand.hbm [shape: bf16[32,32], index: 4, kind: input, shape index: {}]   ;;  %s2055_s5 = inlined_call_operand.vmem [shape: bf16[32,32], index: 5, kind: input, shape index: {}]   ;;  %s2056_s6 = inlined_call_operand.hbm [shape: bf16[32,32], index: 6, kind: input, shape index: {}]   ;;  %s2057_s7 = inlined_call_operand.vmem [shape: f32[1,32], index: 7, kind: input, shape index: {}]   ;;  %s2058_s8 = inlined_call_operand.vmem [shape: f32[1,32], index: 8, kind: input, shape index: {}]   ;;  %s2059_s9 = inlined_call_operand.vmem [shape: f32[1,32], index: 9, kind: input, shape index: {}]   ;;  %s2060_s10 = inlined_call_operand.vmem [shape: f32[1,32], index: 10, kind: input, shape index: {}]   ;;  %s2061_s11 = inlined_call_operand.hbm [shape: f32[2,8,32], index: 11, kind: output, shape index: {}]  }
   0x1   :  { %2088 = sst [smem:[#allocation29_spill]] %s2051_s1 }
   0x2   :  { %2089 = sst [smem:[#allocation30_spill]] %s2053_s3 }
   0x3   :  { %2090 = sst [smem:[#allocation31_spill]] %s2057_s7 }
   0x4   :  { %2091 = sst [smem:[#allocation32_spill]] %s2058_s8 }
   0x5   :  { %2092 = sst [smem:[#allocation33_spill]] %s2059_s9 }
   0x6   :  { %2093 = sst [smem:[#allocation34_spill]] %s2060_s10 }
   0x7   :  { %2094 = sst [smem:[#allocation35_spill]] %s2061_s11 }
   0x8   :  { %16 = vsyncpa [#allocation5], 0 }
   0x9   :  { %18 = vsyncpa [#allocation5 + $0x1], 0 }
   0xa   :  { %19 = vsyncpa [#allocation8], 0 }
   0xb   :  { %21 = vsyncpa [#allocation8 + $0x1], 0 }
   0xc   :  { %22 = vsyncpa [#allocation11], 0 }
   0xd   :  { %23 = vsyncpa [#allocation14], 0 }
   0xe   :  { %24 = vsyncpa [#allocation6], 0 }
   0xf   :  { %26 = vsyncpa [#allocation6 + $0x1], 0  ;;  %s1657_s17 = smov 0   ;;  %s1659_s18 = smov 0  }
  0x10   :  { %s1661_s19 = smov 0   ;;  %s1663_s20 = smov 0  }
  0x11   :  { %s1665_s21 = smov 0   ;;  %s1667_s22 = smov 0  }
  0x12 LB: > { %2095 = sst [smem:[#allocation21_spill]] %s1564_s17  ;;  %s1688_s23 = sadd.s32 4294967295, %s1584_s22   ;;  %s1584_s22 = sphi %s1667_s22, %s32_s22   ;;  %s1580_s21 = sphi %s1665_s21, %s2143_s21   ;;  %s1576_s20 = sphi %s1663_s20, %s2142_s20   ;;  %s1572_s19 = sphi %s1661_s19, %s2146_s19   ;;  %s1568_s18 = sphi %s1659_s18, %s2145_s18   ;;  %s1564_s17 = sphi %s1657_s17, %s2144_s17  }
  0x13   : > { %2096 = sst [smem:[#allocation22_spill]] %s1576_s20  ;;  %s1095_s24 = sadd.s32 4294967294, %s1584_s22  }
  0x14   : > { %2097 = sst [smem:[#allocation23_spill]] %s1580_s21  ;;  %p66_p0 = scmp.ne.s32.totalorder %s1568_s18, %s1564_s17 }
  0x15   : > { %2098 = sst [smem:[#allocation24_spill]] %s1584_s22  ;;  %p2064_p1 = scmp.eq.s32.totalorder %s1688_s23, 0 }
  0x16   : > { %p318_p3 = scmp.eq.s32.totalorder %s1095_s24, 1  ;;  %p1096_p5 = scmp.ge.s32.totalorder %s1584_s22, 1 }
  0x17   : > { %p1697_p4 = por %p2064_p1, %p66_p0  ;;  %p325_p7 = scmp.lt.s32.totalorder %s1584_s22, 3 }
  0x18   : > { %p1702_p6 = por %p318_p3, %p66_p0  ;;  %s1586_s28 = smov [#allocation10]  }
  0x19   : > { %s2099_s25 = scalar_select %p1697_p4, 1, 0 }
  0x1a   : > { %s2100_s26 = scalar_select %p1702_p6, 1, 0 }
  0x1b   : > { %p1707_p8 = pnand %p1096_p5, %p325_p7  ;;  %s337_s29 = sshll.u32 %s1586_s28, 4  ;;  %s338_s29 = int_to_ptr.vmem [resolvable:$true] %s337_s29 }
  0x1c   : > { %2101 = sst [smem:[#allocation25_spill]] %s2100_s26  ;;  %s44_s12 = sadd.s32 1, %s1580_s21 }
  0x1d   : > { %s2102_s27 = scalar_select %p1707_p8, 1, 0 }
  0x1e   : > { %p1217_p9 = pneg %p1707_p8  ;;  %s2104_s3 = sld [smem:[#allocation30_spill]] }
  0x20   : > { %p1716_p11 = pnand %p1217_p9, %p2064_p1 }
  0x22   : > { %s2103_s30 = scalar_select %p1716_p11, 1, 0 }
  0x23   : > { %p1729_p13 = pneg %p1716_p11 }
  0x24   : > { %s1316_s15 = scalar_lea.hbm %s2104_s3, 256 }
  0x25   : > { %p1317_p12 = scmp.ne.s32.totalorder %s2104_s3, %s1316_s15  ;;  %p1323_p5 = scmp.lt.u32.totalorder %s1316_s15, %s2104_s3 }
  0x26   : > { %s2105_s28 = scalar_select %p1729_p13, 1, 0 }
  0x27   : > { %p1319_p0 = pnand %p1729_p13, %p1317_p12 }
  0x29   : > { %p1320_p3 = pneg %p1319_p0 }
  0x2b   : > { %p1325_p7 = pnand %p1323_p5, %p1320_p3 }
  0x2d   : > { %1328 = shalt.err (!%p1325_p7)
}
  0x2e   : > { %s1329_s13 = scalar_lea.vmem %s338_s29, 256  ;;  %p1337_p2 = scmp.lt.s32.totalorder %s338_s29, %s338_s29 }
  0x2f   : > { %p1330_p9 = scmp.ne.s32.totalorder %s338_s29, %s1329_s13  ;;  %p1338_p6 = scmp.lt.s32.totalorder %s1329_s13, %s1329_s13 }
  0x31   : > { %p1332_p10 = pnand %p1330_p9, %p1729_p13  ;;  %p1339_p4 = por %p1338_p6, %p1337_p2 }
  0x33   : > { %p1333_p1 = pneg %p1332_p10 }
  0x35   : > { %p1340_p8 = pnand %p1339_p4, %p1333_p1 }
  0x37   : > { %1343 = shalt.err (!%p1340_p8)
}
  0x38   : > { %s2068_s14 = smov 64   ;;  %s2070_s17 = smov 4  }
  0x39   : > { %1220 = dma.hbm_to_vmem [thread:$0]  (!%p1716_p11), %s2104_s3, 256, %s338_s29, [#allocation11], %s2068_s14, %s2068_s14, %s2070_s17  }
  0x3a   : > { %p46_p1 = scmp.ge.s32.totalorder %s44_s12, 2  ;;  %s53_s16 = sadd.s32 1, %s1572_s19 }
  0x3b   : > { %p60_p2 = scmp.ne.s32.totalorder %s1572_s19, %s1568_s18  ;;  %p61_p4 = scmp.eq.s32.totalorder %s1584_s22, 0 }
  0x3c   : > { %s2148_s12 = smov (%p46_p1, %s44_s12), 0  ;;  %p2107_p8 = scmp.eq.s32.totalorder %s1688_s23, 1 }
  0x3d   : > { %2106 = sst [smem:[#allocation26_spill]] %s2148_s12  ;;  %p62_p6 = por %p61_p4, %p60_p2 }
  0x3e   : > { %p1756_p10 = por %p2107_p8, %p60_p2  ;;  %s48_s13 = ssub.s32 %s1580_s21, %s2148_s12 }
  0x3f   : > { %p1244_p12 = scmp.lt.s32.totalorder %s1584_s22, 2  ;;  %p51_p0 = scmp.eq.s32.totalorder %s48_s13, 0 }
  0x40   : > { %s2108_s24 = scalar_select %p1756_p10, 1, 0 }
  0x41   : > { %s2073_s11 = sand.u32 1, %s1572_s19   ;;  %s1769_s26 = sshll.u32 %s1580_s21, 7 }
  0x42   : > { %2109 = sst [smem:[#allocation27_spill]] %s2108_s24  ;;  %s1766_s29 = sshll.u32 %s2073_s11, 3 }
  0x43   : > { %s1772_s15 = scalar_select %p51_p0, %s1572_s19, %s53_s16  }
  0x44   : > { %p1774_p3 = pnand %p1244_p12, %p62_p6  ;;  %s411_s17 = sand.u32 1, %s1584_s22  }
  0x45   : > { %2110 = sst [smem:[#allocation28_spill]] %s1772_s15  ;;  %s2112_s1 = sld [smem:[#allocation29_spill]] }
  0x46   : > { %s2111_s14 = scalar_select %p1774_p3, 1, 0 }
  0x47   : > { %s415_s11 = scalar_lea.vmem [#allocation7], %s1766_s29  ;;  %s1589_s16 = smov [#allocation12]  }
  0x48   : > { %s422_s21 = sshll.u32 %s415_s11, 4  ;;  %s1788_s15 = sshll.u32 %s1589_s16, 4  ;;  %s1786_s21 = int_to_ptr.vmem [resolvable:$true] %s422_s21  ;;  %s351_s15 = int_to_ptr.vmem [resolvable:$true] %s1788_s15 }
  0x49   : > { %s1790_s24 = scalar_lea.sflag [#allocation8], %s411_s17  ;;  %p1796_p7 = pneg %p1774_p3 }
  0x4b   : > { %s1783_s13 = scalar_lea.hbm %s2112_s1, %s1769_s26  ;;  %s1349_s22 = scalar_lea.hbm %s2112_s1, 256 }
  0x4c   : > { %s1344_s10 = scalar_lea.hbm %s1783_s13, 128  ;;  %p1350_p2 = scmp.lt.u32.totalorder %s1783_s13, %s2112_s1 }
  0x4d   : > { %p1345_p5 = scmp.ne.s32.totalorder %s1783_s13, %s1344_s10  ;;  %p1351_p4 = scmp.lt.u32.totalorder %s1349_s22, %s1344_s10 }
  0x4e   : > { %s2113_s3 = scalar_select %p1796_p7, 1, 0 }
  0x4f   : > { %p1347_p9 = pnand %p1796_p7, %p1345_p5  ;;  %p1352_p6 = por %p1351_p4, %p1350_p2 }
  0x50   : > { %p1353_p8 = scmp.lt.u32.totalorder %s1344_s10, %s1783_s13 }
  0x51   : > { %p1348_p1 = pneg %p1347_p9 }
  0x52   : > { %p1354_p12 = por %p1353_p8, %p1352_p6 }
  0x54   : > { %p1355_p0 = pnand %p1354_p12, %p1348_p1 }
  0x56   : > { %1358 = shalt.err (!%p1355_p0)
}
  0x57   : > { %s1359_s17 = scalar_lea.vmem %s1786_s21, 128  ;;  %s1590_s12 = smov [#allocation7]  }
  0x58   : > { %p1360_p5 = scmp.ne.s32.totalorder %s1786_s21, %s1359_s17  ;;  %s1364_s11 = sshll.u32 %s1590_s12, 4  ;;  %s1365_s11 = int_to_ptr.vmem [resolvable:$false] %s1364_s11 }
  0x59   : > { %s1366_s20 = scalar_lea.vmem %s1365_s11, 256  ;;  %p1367_p11 = scmp.lt.s32.totalorder %s1786_s21, %s1365_s11 }
  0x5a   : > { %p1362_p9 = pnand %p1360_p5, %p1796_p7  ;;  %p1368_p13 = scmp.lt.s32.totalorder %s1366_s20, %s1359_s17 }
  0x5c   : > { %p1363_p10 = pneg %p1362_p9  ;;  %p1369_p2 = por %p1368_p13, %p1367_p11 }
  0x5e   : > { %p1370_p4 = pnand %p1369_p2, %p1363_p10 }
  0x60   : > { %1373 = shalt.err (!%p1370_p4)
}
  0x61   : > { %1233 = dma.hbm_to_vmem [thread:$0]  (!%p1774_p3), %s1783_s13, 128, %s1786_s21, %s1790_s24  }
  0x62   : > { %s1374_s16 = scalar_lea.hbm %s2054_s4, 256  ;;  %p2114_p11 = scmp.ne.s32.totalorder %s2105_s28, 0 }
  0x63   : > { %p1375_p1 = scmp.ne.s32.totalorder %s2054_s4, %s1374_s16  ;;  %p1381_p6 = scmp.lt.u32.totalorder %s1374_s16, %s2054_s4 }
  0x65   : > { %p1377_p13 = pnand %p1375_p1, %p2114_p11 }
  0x67   : > { %p1378_p10 = pneg %p1377_p13 }
  0x69   : > { %p1383_p8 = pnand %p1381_p6, %p1378_p10 }
  0x6b   : > { %1386 = shalt.err (!%p1383_p8)
}
  0x6c   : > { %s1387_s20 = scalar_lea.vmem %s351_s15, 256  ;;  %p1395_p9 = scmp.lt.s32.totalorder %s351_s15, %s351_s15 }
  0x6d   : > { %p1388_p12 = scmp.ne.s32.totalorder %s351_s15, %s1387_s20  ;;  %p1396_p2 = scmp.lt.s32.totalorder %s1387_s20, %s1387_s20 }
  0x6f   : > { %p1390_p0 = pnand %p1388_p12, %p2114_p11  ;;  %p1397_p4 = por %p1396_p2, %p1395_p9 }
  0x71   : > { %p1391_p5 = pneg %p1390_p0 }
  0x73   : > { %p1398_p3 = pnand %p1397_p4, %p1391_p5 }
  0x75   : > { %1401 = shalt.err (!%p1398_p3)
}
  0x76   : > { %p2115_p1 = scmp.ne.s32.totalorder %s2103_s30, 0  ;;  %s2116_s1 = smov 4  }
  0x77   : > { %s2117_s21 = smov 64   ;;  %s1591_s22 = smov [#allocation13]  }
  0x78   : > { %1223 = dma.hbm_to_vmem [thread:$0]  (!%p2115_p1), %s2054_s4, 256, %s351_s15, [#allocation11], %s2117_s21, %s2117_s21, %s2116_s1  }
  0x79   : > { %s366_s16 = sshll.u32 %s1591_s22, 4  ;;  %s1402_s11 = scalar_lea.hbm %s2056_s6, 256  ;;  %s367_s16 = int_to_ptr.vmem [resolvable:$true] %s366_s16 }
  0x7a   : > { %p1403_p3 = scmp.ne.s32.totalorder %s2056_s6, %s1402_s11  ;;  %p1409_p6 = scmp.lt.u32.totalorder %s1402_s11, %s2056_s6 }
  0x7c   : > { %p1405_p13 = pnand %p1403_p3, %p2114_p11 }
  0x7e   : > { %p1406_p10 = pneg %p1405_p13 }
  0x80   : > { %p1411_p8 = pnand %p1409_p6, %p1406_p10 }
  0x82   : > { %1414 = shalt.err (!%p1411_p8)
}
  0x83   : > { %s1415_s15 = scalar_lea.vmem %s367_s16, 256  ;;  %p1423_p9 = scmp.lt.s32.totalorder %s367_s16, %s367_s16 }
  0x84   : > { %p1416_p12 = scmp.ne.s32.totalorder %s367_s16, %s1415_s15  ;;  %p1424_p2 = scmp.lt.s32.totalorder %s1415_s15, %s1415_s15 }
  0x86   : > { %p1418_p0 = pnand %p1416_p12, %p2114_p11  ;;  %p1425_p4 = por %p1424_p2, %p1423_p9 }
  0x88   : > { %p1419_p5 = pneg %p1418_p0 }
  0x8a   : > { %p1426_p7 = pnand %p1425_p4, %p1419_p5 }
  0x8c   : > { %1429 = shalt.err (!%p1426_p7)
}
  0x8d   : > { %1226 = dma.hbm_to_vmem [thread:$0]  (!%p2115_p1), %s2056_s6, 256, %s367_s16, [#allocation14], %s2117_s21, %s2117_s21, %s2116_s1  }
  0x8e   : > { %s1867_s13 = scalar_lea.hbm %s2050_s0, %s1769_s26  ;;  %s396_s30 = scalar_lea.vmem [#allocation4], %s1766_s29 }
  0x8f   : > { %s404_s10 = sshll.u32 %s396_s30, 4  ;;  %s2118_s22 = sand.u32 1, %s1572_s19   ;;  %s405_s10 = int_to_ptr.vmem [resolvable:$true] %s404_s10 }
  0x90   : > { %s393_s12 = scalar_lea.sflag [#allocation5], %s2118_s22  ;;  %s1430_s17 = scalar_lea.hbm %s1867_s13, 128 }
  0x91   : > { %p1431_p7 = scmp.ne.s32.totalorder %s1867_s13, %s1430_s17  ;;  %p2119_p11 = scmp.ne.s32.totalorder %s2113_s3, 0 }
  0x92   : > { %s1435_s16 = scalar_lea.hbm %s2050_s0, 256  ;;  %p1436_p1 = scmp.lt.u32.totalorder %s1867_s13, %s2050_s0 }
  0x93   : > { %p1433_p3 = pnand %p1431_p7, %p2119_p11  ;;  %p1437_p10 = scmp.lt.u32.totalorder %s1435_s16, %s1430_s17 }
  0x94   : > { %p1439_p8 = scmp.lt.u32.totalorder %s1430_s17, %s1867_s13 }
  0x95   : > { %p1434_p13 = pneg %p1433_p3  ;;  %p1438_p6 = por %p1437_p10, %p1436_p1 }
  0x97   : > { %p1440_p12 = por %p1439_p8, %p1438_p6 }
  0x99   : > { %p1441_p0 = pnand %p1440_p12, %p1434_p13 }
  0x9b   : > { %1444 = shalt.err (!%p1441_p0)
}
  0x9c   : > { %s1445_s15 = scalar_lea.vmem %s405_s10, 128  ;;  %s1592_s7 = smov [#allocation4]  }
  0x9d   : > { %p1446_p5 = scmp.ne.s32.totalorder %s405_s10, %s1445_s15  ;;  %s1450_s8 = sshll.u32 %s1592_s7, 4  ;;  %s1451_s8 = int_to_ptr.vmem [resolvable:$false] %s1450_s8 }
  0x9e   : > { %s1452_s9 = scalar_lea.vmem %s1451_s8, 256  ;;  %p1453_p4 = scmp.lt.s32.totalorder %s405_s10, %s1451_s8 }
  0x9f   : > { %p1448_p9 = pnand %p1446_p5, %p2119_p11  ;;  %p1454_p7 = scmp.lt.s32.totalorder %s1452_s9, %s1445_s15 }
  0xa1   : > { %p1449_p2 = pneg %p1448_p9  ;;  %p1455_p3 = por %p1454_p7, %p1453_p4 }
  0xa3   : > { %p1456_p1 = pnand %p1455_p3, %p1449_p2 }
  0xa5   : > { %1459 = shalt.err (!%p1456_p1)
}
  0xa6   : > { %p2120_p10 = scmp.ne.s32.totalorder %s2111_s14, 0  ;;  %s1893_s22 = scalar_lea.hbm %s2052_s2, %s1769_s26 }
  0xa7   : > { %s433_s17 = scalar_lea.vmem [#allocation9], %s1766_s29  ;;  %s1460_s21 = scalar_lea.hbm %s1893_s22, 128 }
  0xa8   : > { %1230 = dma.hbm_to_vmem [thread:$0]  (!%p2120_p10), %s1867_s13, 128, %s405_s10, %s393_s12  }
  0xa9   : > { %s440_s1 = sshll.u32 %s433_s17, 4  ;;  %p1461_p13 = scmp.ne.s32.totalorder %s1893_s22, %s1460_s21  ;;  %s441_s1 = int_to_ptr.vmem [resolvable:$true] %s440_s1 }
  0xaa   : > { %s1465_s13 = scalar_lea.hbm %s2052_s2, 256  ;;  %p1466_p12 = scmp.lt.u32.totalorder %s1893_s22, %s2052_s2 }
  0xab   : > { %p1463_p6 = pnand %p1461_p13, %p2119_p11  ;;  %p1467_p0 = scmp.lt.u32.totalorder %s1465_s13, %s1460_s21 }
  0xac   : > { %p1469_p9 = scmp.lt.u32.totalorder %s1460_s21, %s1893_s22 }
  0xad   : > { %p1464_p8 = pneg %p1463_p6  ;;  %p1468_p5 = por %p1467_p0, %p1466_p12 }
  0xaf   : > { %p1470_p2 = por %p1469_p9, %p1468_p5 }
  0xb1   : > { %p1471_p4 = pnand %p1470_p2, %p1464_p8 }
  0xb3   : > { %1474 = shalt.err (!%p1471_p4)
}
  0xb4   : > { %s1475_s29 = scalar_lea.vmem %s441_s1, 128  ;;  %s1593_s26 = smov [#allocation9]  }
  0xb5   : > { %p1476_p7 = scmp.ne.s32.totalorder %s441_s1, %s1475_s29  ;;  %s1480_s20 = sshll.u32 %s1593_s26, 4  ;;  %s1481_s20 = int_to_ptr.vmem [resolvable:$false] %s1480_s20 }
  0xb6   : > { %s1482_s15 = scalar_lea.vmem %s1481_s20, 256  ;;  %p1483_p13 = scmp.lt.s32.totalorder %s441_s1, %s1481_s20 }
  0xb7   : > { %p1478_p3 = pnand %p1476_p7, %p2119_p11  ;;  %p1484_p6 = scmp.lt.s32.totalorder %s1482_s15, %s1475_s29 }
  0xb9   : > { %p1479_p1 = pneg %p1478_p3  ;;  %p1485_p10 = por %p1484_p6, %p1483_p13 }
  0xbb   : > { %p1486_p0 = pnand %p1485_p10, %p1479_p1 }
  0xbd   : > { %1489 = shalt.err (!%p1486_p0)
}
  0xbe   : > { %p2121_p12 = scmp.ne.s32.totalorder %s2111_s14, 0  ;;  %p2122_p8 = scmp.ne.s32.totalorder %s2102_s27, 0 }
  0xbf   : > { %s1917_s3 = sand.u32 (!%p2122_p8), 1, %s1568_s18   ;;  %p2123_p11 = scmp.ne.s32.totalorder (!%p2122_p8), %s2099_s25, 0 }
  0xc0   : > { %1236 = dma.hbm_to_vmem [thread:$0]  (!%p2121_p12), %s1893_s22, 128, %s441_s1, %s1790_s24  }
  0xc1   : > { %449 = sbr.rel (%p2122_p8) target bundleno = 1269 (0x4f5), region = 64  ;;  %s1920_s7 = sshll.u32 (!%p2122_p8), %s1917_s3, 3 }
  0xc2   : > { %s452_s8 = scalar_lea.sflag (!%p2122_p8), [#allocation5], %s1917_s3  ;;  %s455_s9 = scalar_lea.vmem (!%p2122_p8), [#allocation4], %s1920_s7 }
  0xc8   : > { %1543 = dma.done.wait (%p2123_p11), %s452_s8, 128  }
  0xc9   : > { %1545 = vsyncadd (%p2123_p11), %s452_s8, 4294967168  ;;  %s460_s27 = sand.u32 1, %s1688_s23   ;;  %s464_s24 = scalar_lea.vmem [#allocation7], %s1920_s7 }
  0xca   : > { %s461_s14 = scalar_lea.sflag [#allocation8], %s460_s27 }
  0xcb   : > { %1547 = dma.done.wait (%p2123_p11), %s461_s14, 256  }
  0xcc   : > { %1549 = vsyncadd (%p2123_p11), %s461_s14, 4294967040  ;;  %s473_s28 = scalar_lea.vmem [#allocation9], %s1920_s7  ;;  %p2124_p10 = scmp.eq.s32.totalorder %s1688_s23, 0 }
  0xce   : > { %1551 = dma.done.wait (%p2124_p10), [#allocation11], 512   ;;  %p2125_p5 = pmov %p2124_p10 }
  0xd0   : > { %1553 = vsyncadd (%p2125_p5), [#allocation11], 4294966784  ;;  %p2126_p9 = pmov %p2125_p5 }
  0xd1   : > { %p2127_p2 = pmov %p2125_p5 }
  0xd2   : > { %1555 = dma.done.wait (%p2126_p9), [#allocation14], 256  }
  0xd3   : > { %1557 = vsyncadd (%p2127_p2), [#allocation14], 4294967040  ;;  %v1594_v0 = vmov 0.0   ;;  %vm1595_vm0 = vmmov 0   ;;  %v1304_v1 = vld [vmem:[#allocation12] sm:$0xff]   ;;  %v1305_v2 = vld [vmem:[#allocation12 + $0x8] sm:$0xff]  }
  0xd4   : > { %1153 = vmatprep.subr.bf16.mxu0 %v1594_v0  ;;  %1157 = vmatprep.mubr.msk.bf16.mxu0 %vm1595_vm0, %v1594_v0  ;;  %v539_v3 = vld [vmem:[%s464_s24] sm:$0xff]  ;;  %vm564_vm1 = vcmask 261120   ;;  %v681_v7 = vld [vmem:[%s455_s9] sm:$0xff]  ;;  %s2128_s21 = sld [smem:[#allocation32_spill]]  ;;  %vm677_vm2 = vcmask 257024   ;;  %s2129_s13 = sld [smem:[#allocation31_spill]] }
  0xd5   : > { %1161 = vmatprep.subr.bf16.mxu1 %v1594_v0  ;;  %1165 = vmatprep.mubr.msk.bf16.mxu1 %vm1595_vm0, %v1594_v0  ;;  %v1306_v4 = vld [vmem:[#allocation10] sm:$0xff]   ;;  %v540_v5 = vpack.c.bf16 %v539_v3, %v539_v3  ;;  %v1307_v6 = vld [vmem:[#allocation10 + $0x8] sm:$0xff]   ;;  %v682_v8 = vpack.c.bf16 %v681_v7, %v681_v7  ;;  %v1309_v10 = vld [vmem:[%s2055_s5 + $0x8] sm:$0xff]   ;;  %s2130_s29 = sld [smem:[#allocation33_spill]]  ;;  %vm813_vm3 = vcmask 1043456   ;;  %vm798_vm4 = vcmask 64512  }
  0xd6   : > { %1154 = vmatpush3.bf16.msra.mxu0 %v1304_v1  ;;  %v1308_v9 = vld [vmem:[%s2055_s5] sm:$0xff]   ;;  %v608_v11 = vld [vmem:[%s473_s28] sm:$0xff]  ;;  %v1310_v49 = vld [vmem:[#allocation13] sm:$0xff]   ;;  %s2131_s26 = sld [smem:[#allocation22_spill]]  ;;  %s2132_s8 = sld [smem:[#allocation34_spill]] }
  0xd7   : > { %1155 = vmatprep.subr.bf16.mxu0 %v1594_v0  ;;  %1162 = vmatpush3.bf16.msra.mxu1 %v1308_v9  ;;  %v609_v12 = vpack.c.bf16 %v608_v11, %v608_v11  ;;  %v1311_v50 = vld [vmem:[#allocation13 + $0x8] sm:$0xff]   ;;  %s2133_s9 = sld [smem:[#allocation27_spill]]  ;;  %s533_s14 = scalar_lea.vmem [#allocation15], %s1920_s7 }
  0xd8   : > { %1163 = vmatprep.subr.bf16.mxu1 %v1594_v0  ;;  %s942_s24 = sshll.u32 %s533_s14, 4  ;;  %s2134_s25 = sld [smem:[#allocation35_spill]]  ;;  %s2002_s24 = int_to_ptr.vmem [resolvable:$true] %s942_s24 }
  0xd9   : > { %s928_s22 = scalar_lea.sflag [#allocation6], %s1917_s3  ;;  %s1490_s7 = scalar_lea.vmem %s2002_s24, 128 }
  0xda   : > { %1156 = vmatpush3.bf16.msra.mxu0 %v1305_v2  ;;  %v1115_v13 = vld [vmem:[%s2128_s21] ss:$0 sm:$0xff]  ;;  %p1491_p4 = scmp.ne.s32.totalorder %s2002_s24, %s1490_s7  ;;  %s1596_s17 = smov [#allocation15]  }
  0xdb   : > { %1169 = vmatprep.subr.bf16.mxu0 %v1594_v0  ;;  %1164 = vmatpush3.bf16.msra.mxu1 %v1309_v10  ;;  %v1123_v22 = vld [vmem:[%s2129_s13] ss:$0 sm:$0xff]  ;;  %s1494_s1 = sshll.u32 %s1596_s17, 4  ;;  %s1495_s1 = int_to_ptr.vmem [resolvable:$false] %s1494_s1 }
  0xdc   : > { %1177 = vmatprep.subr.bf16.mxu1 %v1594_v0  ;;  %v1119_v29 = vld [vmem:[%s2130_s29] ss:$0 sm:$0xff]  ;;  %s1134_s27 = sshll.u32 %s2131_s26, 7  ;;  %s1496_s21 = scalar_lea.vmem %s1495_s1, 256 }
  0xdd   : > { %1158 = vmatmul.mubr.msk.bf16.vlgmr.msra.gmra.mrb[0].mxu0 %vm564_vm1, %v540_v5  ;;  %v1129_v59 = vld [vmem:[%s2132_s8] ss:$0 sm:$0xff]  ;;  %p2135_p7 = scmp.ne.s32.totalorder %s2133_s9, 0  ;;  %p1497_p13 = scmp.lt.s32.totalorder %s2002_s24, %s1495_s1 }
  0xde   : > { %1170 = vmatpush3.bf16.msra.mxu0 %v1306_v4  ;;  %1173 = vmatprep.mubr.msk.bf16.mxu0 %vm1595_vm0, %v1594_v0  ;;  %s2000_s30 = scalar_lea.hbm %s2134_s25, %s1134_s27  ;;  %p1498_p6 = scmp.lt.s32.totalorder %s1496_s21, %s1490_s7 }
  0xdf   : > { %1171 = vmatprep.subr.bf16.mxu0 %v1594_v0  ;;  %1166 = vmatmul.mubr.msk.bf16.vlgmr.msra.gmra.mrb[0].mxu1 %vm564_vm1, %v609_v12  ;;  %p1492_p3 = pnand %p1491_p4, %p2135_p7 }
  0xe0   : > { %1179 = vmatprep.mubr.msk.bf16.mxu1 %vm1595_vm0, %v1594_v0  ;;  %p1499_p0 = por %p1498_p6, %p1497_p13 }
  0xe1   : > { %p1493_p1 = pneg %p1492_p3 }
  0xe2   : > { %1172 = vmatpush3.bf16.msra.mxu0 %v1307_v6 }
  0xe3   : > { %1183 = vmatprep.subr.bf16.mxu0 %v1594_v0  ;;  %p1500_p12 = pnand %p1499_p0, %p1493_p1 }
  0xe5   : > { %1174 = vmatmul.mubr.msk.bf16.vlgmr.msra.gmra.mrb[4].mxu0 %vm564_vm1, %v682_v8 }
  0xe6   : > { %1185 = vmatprep.mubr.msk.bf16.mxu0 %vm1595_vm0, %v1594_v0 }
 0x1b0   : > { %v602_v14 = vpop.f32.mrb[0].mxu0 }
 0x1b1   : > { %v603_v15 = vadd.f32 %v1115_v13, %v602_v14  ;;  %v1159_v16 = vpop.f32.mrb[1].mxu0 }
 0x1b2   : > { %v605_v17 = vpop.f32.mrb[2].mxu0  ;;  %v670_v30 = vpop.f32.mrb[0].mxu1 }
 0x1b3   : > { %v676_v18 = vpack.c.bf16 %v603_v15, %v603_v15  ;;  %v1160_v19 = vpop.f32.mrb[3].mxu0  ;;  %v671_v31 = vadd.f32 %v1119_v29, %v670_v30  ;;  %v1167_v32 = vpop.f32.mrb[1].mxu1 }
 0x1b4   : > { %v673_v33 = vpop.f32.mrb[2].mxu1 }
 0x1b5   : > { %678 = vst.msk [vmem:[#allocation2] sm:$0xf] %vm677_vm2, %v676_v18  ;;  %v679_v34 = vpack.c.bf16 %v671_v31, %v671_v31  ;;  %v1168_v35 = vpop.f32.mrb[3].mxu1 }
 0x1b7   : > { %680 = vst.msk [vmem:[#allocation3] sm:$0xf] %vm677_vm2, %v679_v34 }
 0x1b8   : > { %v744_v20 = vpop.f32.mrb[4].mxu0 }
 0x1b9   : > { %v1175_v21 = vpop.f32.mrb[5].mxu0  ;;  %v745_v26 = vadd.f32 %v1123_v22, %v744_v20 }
 0x1ba   : > { %v747_v23 = vpop.f32.mrb[6].mxu0 }
 0x1bb   : > { %v1176_v24 = vpop.f32.mrb[7].mxu0  ;;  %v750_v28 = vpack.c.bf16 %v745_v26, %v745_v26 }
 0x1bc   : > { %v751_v25 = vld [vmem:[#allocation2] sm:$0xf] }
 0x1bd   : > { %v756_v27 = vsel %vm564_vm1, %v751_v25, 0 }
 0x1be   : > { %1178 = vmatpush3.bf16.xpose.msra.mxu1 %v756_v27  ;;  %v809_v36 = vld [vmem:[#allocation3] sm:$0xf] }
 0x1bf   : > { %1189 = vmatprep.subr.bf16.mxu1 %v1594_v0  ;;  %v815_v37 = vsel %vm813_vm3, %v809_v36, 0 }
 0x1c0   : > { %1184 = vmatpush3.bf16.msra.mxu0 %v815_v37 }
 0x1c5   : > { %1180 = vmatmul.mubr.msk.bf16.vlgmr.msra.gmra.mrb[4].mxu1 %vm564_vm1, %v750_v28 }
 0x1c6   : > { %1193 = vmatprep.mubr.msk.bf16.mxu1 %vm1595_vm0, %v1594_v0  ;;  %1190 = vmatpush3.bf16.msra.mxu1 %v1310_v49 }
 0x1c7   : > { %1191 = vmatprep.subr.bf16.mxu1 %v1594_v0 }
 0x1ca   : > { %1192 = vmatpush3.bf16.msra.mxu1 %v1311_v50 }
 0x298   : > { %v792_v38 = vpop.f32.mrb[4].mxu1 }
 0x299   : > { %v1181_v39 = vpop.f32.mrb[5].mxu1  ;;  %v799_v40 = vsel %vm798_vm4, %v792_v38, -inf }
 0x29a   : > { %800 = vmax.xlane.f32.xlu0 %v799_v40  ;;  %v795_v41 = vpop.f32.mrb[6].mxu1 }
 0x29b   : > { %v1182_v42 = vpop.f32.mrb[7].mxu1 }
 0x327   : > { %v801_v43 = vpop.xlane.xlu0 %800 }
 0x328   : > { %v802_v44 = vsub.f32 %v792_v38, %v801_v43 }
 0x32a   : > { %v803_v45 = vmul.f32 1.442695, %v802_v44 }
 0x32c   : > { %1312 = vpow2.f32 %v803_v45 }
 0x336   : > { %v1313_v46 = vpop.eup %1312 }
 0x337   : > { %v805_v47 = vsel %vm798_vm4, %v1313_v46, 0.0  ;;  %v808_v48 = vpack.c.bf16 %v1313_v46, %v1313_v46 }
 0x338   : > { %806 = vadd.xlane.f32.xlu0 %v805_v47 }
 0x339   : > { %1186 = vmatmul.mubr.msk.bf16.vlgmr.msra.gmra.mrb[8].mxu0 %vm798_vm4, %v808_v48 }
 0x3c5   : > { %v807_v51 = vpop.xlane.xlu0 %806 }
 0x3c6   : > { %1314 = vrcp.f32 %v807_v51 }
 0x3d0   : > { %v1315_v52 = vpop.eup %1314 }
 0x40c   : > { %v851_v53 = vpop.f32.mrb[8].mxu0 }
 0x40d   : > { %v858_v54 = vmul.f32 %v1315_v52, %v851_v53  ;;  %v1187_v55 = vpop.f32.mrb[9].mxu0 }
 0x40e   : > { %v854_v56 = vpop.f32.mrb[10].mxu0 }
 0x40f   : > { %v859_v57 = vpack.c.bf16 %v858_v54, %v858_v54  ;;  %v1188_v58 = vpop.f32.mrb[11].mxu0 }
 0x411   : > { %1194 = vmatmul.mubr.msk.bf16.vlgmr.msra.gmra.mrb[8].mxu1 %vm564_vm1, %v859_v57 }
 0x4e4   : > { %v920_v60 = vpop.f32.mrb[8].mxu1 }
 0x4e5   : > { %v921_v61 = vadd.f32 %v1129_v59, %v920_v60  ;;  %v1195_v62 = vpop.f32.mrb[9].mxu1 }
 0x4e6   : > { %v923_v63 = vpop.f32.mrb[10].mxu1 }
 0x4e7   : > { %v1196_v0 = vpop.f32.mrb[11].mxu1  ;;  %926 = vst.msk [vmem:[%s533_s14] sm:$0xff] %vm564_vm1, %v921_v61 }
 0x4e8   : > { %1503 = shalt.err (!%p1500_p12)
}
 0x4e9   : > { %s1504_s3 = scalar_lea.hbm %s2000_s30, 128  ;;  %s1508_s13 = scalar_lea.hbm %s2134_s25, 256 }
 0x4ea   : > { %p1505_p8 = scmp.ne.s32.totalorder %s2000_s30, %s1504_s3  ;;  %p1509_p5 = scmp.lt.u32.totalorder %s2000_s30, %s2134_s25 }
 0x4eb   : > { %p1510_p9 = scmp.lt.u32.totalorder %s1508_s13, %s1504_s3  ;;  %p1512_p4 = scmp.lt.u32.totalorder %s1504_s3, %s2000_s30 }
 0x4ec   : > { %p1506_p11 = pnand %p1505_p8, %p2135_p7 }
 0x4ed   : > { %p1511_p2 = por %p1510_p9, %p1509_p5 }
 0x4ee   : > { %p1507_p10 = pneg %p1506_p11 }
 0x4ef   : > { %p1513_p3 = por %p1512_p4, %p1511_p2 }
 0x4f1   : > { %p1514_p1 = pnand %p1513_p3, %p1507_p10 }
 0x4f3   : > { %1517 = shalt.err (!%p1514_p1)
}
 0x4f4   : > { %1215 = dma.vmem_to_hbm [thread:$0]  (%p2135_p7), %s2002_s24, 128, %s2000_s30, %s928_s22  }
 0x4f5 PF: > { %s2136_s29 = sld [smem:[#allocation21_spill]]  ;;  %s2137_s26 = sld [smem:[#allocation25_spill]] }
 0x4f6   : > { %s2138_s20 = sld [smem:[#allocation24_spill]] }
 0x4fb   : > { %s954_s15 = sand.u32 1, %s2136_s29   ;;  %p2139_p13 = scmp.ne.s32.totalorder %s2137_s26, 0 }
 0x4fc   : > { %p2140_p6 = scmp.ge.s32.totalorder %s2138_s20, 2  ;;  %s955_s8 = scalar_lea.sflag [#allocation6], %s954_s15 }
 0x4fe   : > { %p1238_p0 = pnand %p2140_p6, %p2139_p13 }
 0x500   : > { %1559 = dma.done.wait (!%p1238_p0), %s955_s8, 128  }
 0x501   : > { %1561 = vsyncadd (!%p1238_p0), %s955_s8, 4294967168  ;;  %s32_s22 = sadd.s32 1, %s2138_s20   ;;  %s2141_s9 = sld [smem:[#allocation28_spill]] }
 0x502   : > { %p29_p12 = scmp.ge.s32.totalorder %s32_s22, 4   ;;  %s2142_s20 = sld [smem:[#allocation23_spill]] }
 0x503   : > { %s2143_s21 = sld [smem:[#allocation26_spill]]  ;;  %s2144_s17 = smov %s1568_s18 }
 0x504   : > { %s2145_s18 = smov %s1572_s19  ;;  %31 = sbr.rel (!%p29_p12) target bundleno = 18 (0x12), region = 149 }
 0x507   : > { %s2146_s19 = smov %s2141_s9 }
 0x50b   :  { %960 = vsyncpa [#allocation5], 1 }
 0x50c   :  { %962 = vsyncpa [#allocation5 + $0x1], 1 }
 0x50d   :  { %963 = vsyncpa [#allocation8], 1 }
 0x50e   :  { %965 = vsyncpa [#allocation8 + $0x1], 1 }
 0x50f   :  { %966 = vsyncpa [#allocation11], 1 }
 0x510   :  { %967 = vsyncpa [#allocation14], 1 }
 0x511   :  { %968 = vsyncpa [#allocation6], 1 }
 0x512   :  { %970 = vsyncpa [#allocation6 + $0x1], 1 }

</bundles_post_ra>
